<compile_context>
chip_gen: v6e
topology: v6e:2x2x1
jax: 0.10.0
libtpu: 0.0.40
codegen_flags: <defaults>
</compile_context>

<pallas_src>
import functools

import jax
import jax.numpy as jnp
from jax import lax
from jax.experimental import pallas as pl
from jax.experimental.pallas import tpu as pltpu

LANE_W = 512            # lane-dense last dim (multiple of 128)
MAX_BLOCK_ROWS = 2048   # 2048 x 512 f32 = 4 MiB per block buffer
_VMEM_LIMIT = 32 * 1024 * 1024


# ---------------------------------------------------------------------------
# helpers
# ---------------------------------------------------------------------------
def _cdiv(a, b):
    return (a + b - 1) // b


def _round_up(a, b):
    return _cdiv(a, b) * b


def _tile_geometry(n_elems):
    """Lane-dense (rows, 512) slab split into num_tiles blocks of block_rows.

    Padding is bounded by < 8 rows per tile (sublane alignment only), instead of
    rounding rows up to a multiple of MAX_BLOCK_ROWS.
    """
    rows = _cdiv(n_elems, LANE_W)
    rows8 = _round_up(rows, 8)                       # sublane multiple of 8
    num_tiles = _cdiv(rows8, MAX_BLOCK_ROWS)
    block_rows = _round_up(_cdiv(rows8, num_tiles), 8)
    rows_padded = block_rows * num_tiles
    return block_rows, rows_padded, num_tiles


def _flatten_pad(x, rows_padded):
    flat = x.reshape(-1)
    total = rows_padded * LANE_W
    if flat.shape[0] != total:
        flat = jnp.pad(flat, (0, total - flat.shape[0]))
    return flat.reshape(rows_padded, LANE_W)


# ---------------------------------------------------------------------------
# kernels
# ---------------------------------------------------------------------------
def _stats_kernel(noise_ref, sum_ref, sq_ref, *, block_rows, tail_valid):
    """Pass 1: global sum / sumsq of (noise - 0.5) over the valid elements.

    sum_ref / sq_ref are (1,1) resident accumulators (same block index for every
    grid step, grid axis marked "arbitrary").  Only the final tile is masked,
    using a tile-local index (< 2^21), so there is no int32 overflow.
    """
    t = pl.program_id(0)
    last = pl.num_programs(0) - 1

    @pl.when(t == 0)
    def _init():
        sum_ref[...] = jnp.zeros_like(sum_ref)
        sq_ref[...] = jnp.zeros_like(sq_ref)

    c = noise_ref[...] - 0.5          # shift for a numerically stable one-pass var

    block_elems = block_rows * LANE_W
    if tail_valid == block_elems:
        # No padding anywhere: unmasked accumulate on every tile.
        sum_ref[...] += jnp.sum(c, keepdims=True)
        sq_ref[...] += jnp.sum(c * c, keepdims=True)
    else:
        @pl.when(t != last)
        def _full():
            sum_ref[...] += jnp.sum(c, keepdims=True)
            sq_ref[...] += jnp.sum(c * c, keepdims=True)

        @pl.when(t == last)
        def _tail():
            row = lax.broadcasted_iota(jnp.int32, (block_rows, LANE_W), 0)
            col = lax.broadcasted_iota(jnp.int32, (block_rows, LANE_W), 1)
            valid = row * LANE_W + col < tail_valid       # tile-local index
            cm = jnp.where(valid, c, 0.0)
            sum_ref[...] += jnp.sum(cm, keepdims=True)
            sq_ref[...] += jnp.sum(cm * cm, keepdims=True)


def _apply_kernel(sb_ref, img_ref, noise_ref, out_ref):
    """Pass 2: out = image + scale * noise + bias (scale/bias folded scalars)."""
    scale = sb_ref[0]
    bias = sb_ref[1]
    out_ref[...] = (img_ref[...].astype(jnp.float32)
                    + scale * noise_ref[...]
                    + bias).astype(out_ref.dtype)


def _prenorm_kernel(w_ref, img_ref, noise_ref, out_ref):
    """User-supplied noise: no normalization (matches PyTorch), tiled elementwise."""
    out_ref[...] = (img_ref[...].astype(jnp.float32)
                    + w_ref[0] * noise_ref[...].astype(jnp.float32)
                    ).astype(out_ref.dtype)


# ---------------------------------------------------------------------------
# wrapper
# ---------------------------------------------------------------------------
def noise_injection(image, weight, noise=None, *, rng_key=None):
    """StyleGAN NoiseInjection forward. image: NCHW (any shape). weight: (1,) scalar."""
    orig_shape = image.shape
    orig_dtype = image.dtype
    n_valid = image.size

    block_rows, rows_padded, num_tiles = _tile_geometry(n_valid)
    has_pad = rows_padded * LANE_W != n_valid

    img2d = _flatten_pad(image, rows_padded)
    w = jnp.asarray(weight, dtype=jnp.float32).reshape(())

    tile_spec = pl.BlockSpec((block_rows, LANE_W), lambda t: (t, 0))
    smem_spec = pl.BlockSpec(memory_space=pltpu.MemorySpace.SMEM)

    def _cparams(sem):
        return pltpu.CompilerParams(dimension_semantics=sem,
                                    vmem_limit_bytes=_VMEM_LIMIT)

    if noise is not None:
        # Keep the user's noise in its native dtype (halves read bytes for bf16);
        # the kernel upcasts per tile.
        noise2d = _flatten_pad(noise, rows_padded)
        out2d = pl.pallas_call(
            _prenorm_kernel,
            out_shape=jax.ShapeDtypeStruct((rows_padded, LANE_W), orig_dtype),
            grid=(num_tiles,),
            in_specs=[smem_spec, tile_spec, tile_spec],
            out_specs=tile_spec,
            compiler_params=_cparams(("parallel",)),
        )(w.reshape(1), img2d, noise2d)
    else:
        if rng_key is None:
            # TODO(synk): torch.rand_like draws fresh noise every forward; JAX is
            # functional, so the caller must pass a fresh rng_key per call.
            raise ValueError("noise_injection: pass rng_key when noise is None")

        # Draw U[0,1) noise directly at the padded slab size (no wrapper pad copy
        # of the noise); pass 1 masks the padded tail, pass 2's padded outputs
        # are sliced off.
        noise2d = jax.random.uniform(rng_key, (rows_padded, LANE_W),
                                     dtype=jnp.float32)

        tail_valid = n_valid - (num_tiles - 1) * block_rows * LANE_W  # static int
        stats_kernel = functools.partial(
            _stats_kernel, block_rows=block_rows, tail_valid=tail_valid)
        s, sq = pl.pallas_call(
            stats_kernel,
            out_shape=(jax.ShapeDtypeStruct((1, 1), jnp.float32),
                       jax.ShapeDtypeStruct((1, 1), jnp.float32)),
            grid=(num_tiles,),
            in_specs=[tile_spec],
            out_specs=(pl.BlockSpec((1, 1), lambda t: (0, 0)),
                       pl.BlockSpec((1, 1), lambda t: (0, 0))),
            compiler_params=_cparams(("arbitrary",)),
        )(noise2d)

        # Finalize (a handful of scalar ops): unbiased std, matching torch.std().
        n = jnp.float32(n_valid)
        mean_c = s[0, 0] / n                                        # E[u] - 0.5
        var = jnp.maximum(sq[0, 0] - n * mean_c * mean_c, 0.0) / (n - 1.0)
        inv_std = 1.0 / (jnp.sqrt(var) + 1e-6)
        mu = mean_c + 0.5
        scale = w * inv_std                 # folded: w / (std + eps)
        bias = -scale * mu                  # folded: -w*mu/(std + eps)
        sb = jnp.stack([scale, bias]).astype(jnp.float32)

        out2d = pl.pallas_call(
            _apply_kernel,
            out_shape=jax.ShapeDtypeStruct((rows_padded, LANE_W), orig_dtype),
            grid=(num_tiles,),
            in_specs=[smem_spec, tile_spec, tile_spec],
            out_specs=tile_spec,
            compiler_params=_cparams(("parallel",)),
        )(sb, img2d, noise2d)

    if has_pad:
        return out2d.reshape(-1)[:n_valid].reshape(orig_shape)
    return out2d.reshape(orig_shape)


# ---------------------------------------------------------------------------
# self-test
# ---------------------------------------------------------------------------
if __name__ == "__main__":
    key = jax.random.PRNGKey(0)
    k_img, k_noise, k_user = jax.random.split(key, 3)

    # Small NCHW feature map (batch=2, channels=4, 16x16 spatial).
    image = jax.random.normal(k_img, (2, 4, 16, 16), dtype=jnp.float32)
    weight = jnp.array([0.7], dtype=jnp.float32)

    # --- path 1: internal noise (global normalization, then image + w*noise) --
    out = noise_injection(image, weight, rng_key=k_noise)
    out = jax.block_until_ready(out)
    # (out - image)/w must be the globally-normalized noise: mean~0, std(ddof=1)~1.
    z = (out - image) / weight[0]
    assert abs(float(jnp.mean(z))) < 1e-3, float(jnp.mean(z))
    assert abs(float(jnp.std(z, ddof=1)) - 1.0) < 1e-3, float(jnp.std(z, ddof=1))

    # weight = 0 -> identity (module init state).
    out0 = noise_injection(image, jnp.zeros((1,), jnp.float32), rng_key=k_noise)
    out0 = jax.block_until_ready(out0)
    assert jnp.allclose(out0, image, atol=1e-6)

    # --- path 2: user-supplied noise (no normalization, as in PyTorch) --------
    user_noise = jax.random.normal(k_user, image.shape, dtype=jnp.float32)
    out_u = jax.block_until_ready(noise_injection(image, weight, noise=user_noise))
    assert jnp.allclose(out_u, image + weight[0] * user_noise, atol=1e-5, rtol=1e-5)

    print("KERNEL_OK")
</pallas_src>

<mosaic_0001>
module attributes {stable_mosaic.version = 11 : i64} {
  func.func @_stats_kernel(%arg0: i32, %arg1: memref<8x512xf32, #tpu.memory_space<vmem>>, %arg2: memref<1x1xf32, #tpu.memory_space<vmem>>, %arg3: memref<1x1xf32, #tpu.memory_space<vmem>>) attributes {dimension_semantics = [#tpu.dimension_semantics<arbitrary>], iteration_bounds = array<i64: 1>, scalar_prefetch = 0 : i64, scratch_operands = 0 : i64, tpu.core_type = #tpu.core_type<tc>, window_params = [{transform_indices = @transform_0, window_bounds = array<i64: 8, 512>}, {pipeline_mode = #tpu.pipeline_mode<synchronous>, transform_indices = @transform_1, window_bounds = array<i64: 1, 1>}, {pipeline_mode = #tpu.pipeline_mode<synchronous>, transform_indices = @transform_2, window_bounds = array<i64: 1, 1>}]} {
    %c0_i32 = arith.constant 0 : i32
    %0 = arith.cmpi eq, %arg0, %c0_i32 : i32
    %1 = arith.extui %0 : i1 to i32
    %c0_i32_0 = arith.constant 0 : i32
    %2 = arith.cmpi ne, %1, %c0_i32_0 : i32
    scf.if %2 {
      %cst_6 = arith.constant 0.000000e+00 : f32
      %12 = vector.broadcast %cst_6 : f32 to vector<1x1xf32>
      %c0_7 = arith.constant 0 : index
      %c0_8 = arith.constant 0 : index
      %13 = vector.load %arg2[%c0_7, %c0_8] : memref<1x1xf32, #tpu.memory_space<vmem>>, vector<1x1xf32>
      tpu.vector_store %arg2[%c0_7, %c0_8], %12 {strides = array<i32>} : memref<1x1xf32, #tpu.memory_space<vmem>>, vector<1x1xf32>,
      %cst_9 = arith.constant 0.000000e+00 : f32
      %14 = vector.broadcast %cst_9 : f32 to vector<1x1xf32>
      %c0_10 = arith.constant 0 : index
      %c0_11 = arith.constant 0 : index
      %15 = vector.load %arg3[%c0_10, %c0_11] : memref<1x1xf32, #tpu.memory_space<vmem>>, vector<1x1xf32>
      tpu.vector_store %arg3[%c0_10, %c0_11], %14 {strides = array<i32>} : memref<1x1xf32, #tpu.memory_space<vmem>>, vector<1x1xf32>,
    } else {
    }
    %c0 = arith.constant 0 : index
    %c0_1 = arith.constant 0 : index
    %3 = vector.load %arg1[%c0, %c0_1] : memref<8x512xf32, #tpu.memory_space<vmem>>, vector<8x512xf32>
    %cst = arith.constant 5.000000e-01 : f32
    %4 = vector.broadcast %cst : f32 to vector<8x512xf32>
    %5 = arith.subf %3, %4 : vector<8x512xf32>
    %c0_i32_2 = arith.constant 0 : i32
    %6 = arith.cmpi ne, %arg0, %c0_i32_2 : i32
    %7 = arith.extui %6 : i1 to i32
    %c0_i32_3 = arith.constant 0 : i32
    %8 = arith.cmpi ne, %7, %c0_i32_3 : i32
    scf.if %8 {
      %c0_6 = arith.constant 0 : index
      %c0_7 = arith.constant 0 : index
      %12 = vector.load %arg2[%c0_6, %c0_7] : memref<1x1xf32, #tpu.memory_space<vmem>>, vector<1x1xf32>
      %13 = vector.shape_cast %5 : vector<8x512xf32> to vector<1x8x512xf32>
      %cst_8 = arith.constant dense<0.000000e+00> : vector<1xf32>
      %14 = vector.multi_reduction <add>, %13, %cst_8 [1, 2] : vector<1x8x512xf32> to vector<1xf32>
      %15 = vector.shape_cast %14 : vector<1xf32> to vector<1x1x1xf32>
      %16 = vector.extract %15[0, 0, 0] : f32 from vector<1x1x1xf32>
      %17 = vector.broadcast %16 : f32 to vector<1x1xf32>
      %18 = arith.addf %12, %17 : vector<1x1xf32>
      %c0_9 = arith.constant 0 : index
      %c0_10 = arith.constant 0 : index
      %19 = vector.load %arg2[%c0_9, %c0_10] : memref<1x1xf32, #tpu.memory_space<vmem>>, vector<1x1xf32>
      tpu.vector_store %arg2[%c0_9, %c0_10], %18 {strides = array<i32>} : memref<1x1xf32, #tpu.memory_space<vmem>>, vector<1x1xf32>,
      %c0_11 = arith.constant 0 : index
      %c0_12 = arith.constant 0 : index
      %20 = vector.load %arg3[%c0_11, %c0_12] : memref<1x1xf32, #tpu.memory_space<vmem>>, vector<1x1xf32>
      %21 = arith.mulf %5, %5 : vector<8x512xf32>
      %22 = vector.shape_cast %21 : vector<8x512xf32> to vector<1x8x512xf32>
      %cst_13 = arith.constant dense<0.000000e+00> : vector<1xf32>
      %23 = vector.multi_reduction <add>, %22, %cst_13 [1, 2] : vector<1x8x512xf32> to vector<1xf32>
      %24 = vector.shape_cast %23 : vector<1xf32> to vector<1x1x1xf32>
      %25 = vector.extract %24[0, 0, 0] : f32 from vector<1x1x1xf32>
      %26 = vector.broadcast %25 : f32 to vector<1x1xf32>
      %27 = arith.addf %20, %26 : vector<1x1xf32>
      %c0_14 = arith.constant 0 : index
      %c0_15 = arith.constant 0 : index
      %28 = vector.load %arg3[%c0_14, %c0_15] : memref<1x1xf32, #tpu.memory_space<vmem>>, vector<1x1xf32>
      tpu.vector_store %arg3[%c0_14, %c0_15], %27 {strides = array<i32>} : memref<1x1xf32, #tpu.memory_space<vmem>>, vector<1x1xf32>,
    } else {
    }
    %c0_i32_4 = arith.constant 0 : i32
    %9 = arith.cmpi eq, %arg0, %c0_i32_4 : i32
    %10 = arith.extui %9 : i1 to i32
    %c0_i32_5 = arith.constant 0 : i32
    %11 = arith.cmpi ne, %10, %c0_i32_5 : i32
    scf.if %11 {
      %12 = tpu.iota {dimensions = array<i32: 0>} : vector<8x512xi32>
      %13 = tpu.iota {dimensions = array<i32: 1>} : vector<8x512xi32>
      %c512_i32 = arith.constant 512 : i32
      %14 = vector.broadcast %c512_i32 : i32 to vector<8x512xi32>
      %15 = arith.muli %12, %14 : vector<8x512xi32>
      %16 = arith.addi %15, %13 : vector<8x512xi32>
      %c2048_i32 = arith.constant 2048 : i32
      %17 = vector.broadcast %c2048_i32 : i32 to vector<8x512xi32>
      %18 = arith.cmpi slt, %16, %17 : vector<8x512xi32>
      %cst_6 = arith.constant 0.000000e+00 : f32
      %19 = vector.broadcast %cst_6 : f32 to vector<8x512xf32>
      %20 = arith.select %18, %5, %19 : vector<8x512xi1>, vector<8x512xf32>
      %c0_7 = arith.constant 0 : index
      %c0_8 = arith.constant 0 : index
      %21 = vector.load %arg2[%c0_7, %c0_8] : memref<1x1xf32, #tpu.memory_space<vmem>>, vector<1x1xf32>
      %22 = vector.shape_cast %20 : vector<8x512xf32> to vector<1x8x512xf32>
      %cst_9 = arith.constant dense<0.000000e+00> : vector<1xf32>
      %23 = vector.multi_reduction <add>, %22, %cst_9 [1, 2] : vector<1x8x512xf32> to vector<1xf32>
      %24 = vector.shape_cast %23 : vector<1xf32> to vector<1x1x1xf32>
      %25 = vector.extract %24[0, 0, 0] : f32 from vector<1x1x1xf32>
      %26 = vector.broadcast %25 : f32 to vector<1x1xf32>
      %27 = arith.addf %21, %26 : vector<1x1xf32>
      %c0_10 = arith.constant 0 : index
      %c0_11 = arith.constant 0 : index
      %28 = vector.load %arg2[%c0_10, %c0_11] : memref<1x1xf32, #tpu.memory_space<vmem>>, vector<1x1xf32>
      tpu.vector_store %arg2[%c0_10, %c0_11], %27 {strides = array<i32>} : memref<1x1xf32, #tpu.memory_space<vmem>>, vector<1x1xf32>,
      %c0_12 = arith.constant 0 : index
      %c0_13 = arith.constant 0 : index
      %29 = vector.load %arg3[%c0_12, %c0_13] : memref<1x1xf32, #tpu.memory_space<vmem>>, vector<1x1xf32>
      %30 = arith.mulf %20, %20 : vector<8x512xf32>
      %31 = vector.shape_cast %30 : vector<8x512xf32> to vector<1x8x512xf32>
      %cst_14 = arith.constant dense<0.000000e+00> : vector<1xf32>
      %32 = vector.multi_reduction <add>, %31, %cst_14 [1, 2] : vector<1x8x512xf32> to vector<1xf32>
      %33 = vector.shape_cast %32 : vector<1xf32> to vector<1x1x1xf32>
      %34 = vector.extract %33[0, 0, 0] : f32 from vector<1x1x1xf32>
      %35 = vector.broadcast %34 : f32 to vector<1x1xf32>
      %36 = arith.addf %29, %35 : vector<1x1xf32>
      %c0_15 = arith.constant 0 : index
      %c0_16 = arith.constant 0 : index
      %37 = vector.load %arg3[%c0_15, %c0_16] : memref<1x1xf32, #tpu.memory_space<vmem>>, vector<1x1xf32>
      tpu.vector_store %arg3[%c0_15, %c0_16], %36 {strides = array<i32>} : memref<1x1xf32, #tpu.memory_space<vmem>>, vector<1x1xf32>,
    } else {
    }
    return
  }
  func.func @transform_0(%arg0: i32) -> (i32, i32) {
    %c0_i32 = arith.constant 0 : i32
    %c0_i32_0 = arith.constant 0 : i32
    return %arg0, %c0_i32 : i32, i32
  }
  func.func @transform_1(%arg0: i32) -> (i32, i32) {
    %c0_i32 = arith.constant 0 : i32
    %c0_i32_0 = arith.constant 0 : i32
    %c0_i32_1 = arith.constant 0 : i32
    return %c0_i32, %c0_i32_0 : i32, i32
  }
  func.func @transform_2(%arg0: i32) -> (i32, i32) {
    %c0_i32 = arith.constant 0 : i32
    %c0_i32_0 = arith.constant 0 : i32
    %c0_i32_1 = arith.constant 0 : i32
    return %c0_i32, %c0_i32_0 : i32, i32
  }
}

</mosaic_0001>

<bundles_post_ra>
// kernel: tpu_custom_call.1
= control target key start
LH: loop header
LB: loop body
LE: loop exit
PB: predicated region body
PF: predicated region fallthrough
CT: control target
= control target key end

     0   :  { %8 = vsyncpa [#allocation3], 0  ;;  %s279_s0 = inlined_call_operand.hbm [shape: f32[8,512], index: 0, kind: input, shape index: {}]   ;;  %s280_s1 = inlined_call_operand.hbm [shape: f32[1,1], index: 1, kind: output, shape index: {0}]   ;;  %s281_s2 = inlined_call_operand.hbm [shape: f32[1,1], index: 2, kind: output, shape index: {1}]  }
   0x1   :  { %9 = vsyncpa [#allocation4], 0 }
   0x2   :  { %10 = vsyncpa [#allocation7], 0  ;;  %s247_s9 = smov [#allocation2]  }
   0x3   :  { %s17_s10 = sshll.u32 %s247_s9, 4  ;;  %s18_s10 = int_to_ptr.vmem [resolvable:$true] %s17_s10 }
   0x4   :  { %s189_s11 = scalar_lea.vmem %s18_s10, 512  ;;  %p194_p1 = scmp.lt.s32.totalorder %s18_s10, %s18_s10 }
   0x5   :  { %p190_p0 = scmp.ne.s32.totalorder %s18_s10, %s189_s11  ;;  %p195_p2 = scmp.lt.s32.totalorder %s189_s11, %s189_s11 }
   0x7   :  { %p196_p3 = por %p195_p2, %p194_p1 }
   0x9   :  { %p197_p4 = pnand %p196_p3, %p190_p0 }
   0xb   :  { %200 = shalt.err (!%p197_p4)
}
   0xc   :  { %20 = dma.hbm_to_vmem [thread:$0]  %s279_s0, 512, %s18_s10, [#allocation3]  }
   0xd   :  { %241 = dma.done.wait [#allocation3], 512  }
   0xe   :  { %242 = vsyncadd [#allocation3], 4294966784  ;;  %v83_v0 = vlaneseq  ;;  %v31_v11 = vld [vmem:[#allocation2] sm:$0xff]  ;;  %v32_v12 = vld [vmem:[#allocation2 + $0x8] sm:$0xff]  ;;  %vm28_vm4 = vcmask 0   ;;  %v248_v33 = vmov 0.0  }
   0xf   :  { %v33_v13 = vld [vmem:[#allocation2 + $0x10] sm:$0xff]  ;;  %v34_v14 = vld [vmem:[#allocation2 + $0x18] sm:$0xff]  ;;  %v169_v15 = vadd.f32 -0.5, %v31_v11  ;;  %v170_v16 = vadd.f32 -0.5, %v32_v12  ;;  %29 = vst.msk [vmem:[#allocation5] sm:$0x1] %vm28_vm4, %v248_v33 }
  0x10   :  { %v84_v1 = vshrl.u32 %v83_v0, 7  ;;  %v86_v2 = vand.u32 127, %v83_v0  ;;  %v171_v17 = vadd.f32 -0.5, %v33_v13  ;;  %v172_v18 = vadd.f32 -0.5, %v34_v14  ;;  %30 = vst.msk [vmem:[#allocation6] sm:$0x1] %vm28_vm4, %v248_v33 }
  0x11   :  { %s249_s0 = smov [#allocation5]   ;;  %s250_s16 = smov [#allocation6]  }
  0x12   :  { %v87_v3 = vadd.s32 128, %v86_v2  ;;  %v88_v4 = vadd.s32 256, %v86_v2  ;;  %v89_v5 = vadd.s32 384, %v86_v2  ;;  %v90_v6 = vmul.u32 512, %v84_v1  ;;  %s146_s14 = sshll.u32 %s249_s0, 4  ;;  %s156_s17 = sshll.u32 %s250_s16, 4  ;;  %s147_s14 = int_to_ptr.vmem [resolvable:$true] %s146_s14  ;;  %s157_s17 = int_to_ptr.vmem [resolvable:$true] %s156_s17 }
  0x13   :  { %s201_s19 = scalar_lea.vmem %s147_s14, 16  ;;  %s205_s20 = scalar_lea.vmem %s147_s14, 32 }
  0x14   :  { %v91_v7 = vadd.s32 %v90_v6, %v86_v2  ;;  %v92_v8 = vadd.s32 %v90_v6, %v87_v3  ;;  %v93_v9 = vadd.s32 %v90_v6, %v88_v4  ;;  %v94_v10 = vadd.s32 %v90_v6, %v89_v5  ;;  %p202_p5 = scmp.ne.s32.totalorder %s147_s14, %s201_s19  ;;  %p206_p6 = scmp.lt.s32.totalorder %s147_s14, %s147_s14 }
  0x15   :  { %p207_p7 = scmp.lt.s32.totalorder %s205_s20, %s201_s19 }
  0x16   :  { %vm95_vm0 = vcmp.lt.s32.totalorder %v91_v7, 2048  ;;  %vm96_vm1 = vcmp.lt.s32.totalorder %v92_v8, 2048  ;;  %vm97_vm2 = vcmp.lt.s32.totalorder %v93_v9, 2048  ;;  %vm98_vm3 = vcmp.lt.s32.totalorder %v94_v10, 2048  ;;  %v103_v48 = vld [vmem:[#allocation5] sm:$0x1] }
  0x17   :  { %v99_v19 = vsel %vm95_vm0, %v169_v15, 0.0  ;;  %v100_v20 = vsel %vm96_vm1, %v170_v16, 0.0  ;;  %v101_v21 = vsel %vm97_vm2, %v171_v17, 0.0  ;;  %v102_v25 = vsel %vm98_vm3, %v172_v18, 0.0  ;;  %v120_v51 = vld [vmem:[#allocation6] sm:$0x1]  ;;  %p208_p8 = por %p207_p7, %p206_p6 }
  0x18   :  { %v104_v22 = vadd.f32 %v100_v20, %v99_v19  ;;  %v121_v23 = vmul.f32 %v99_v19, %v99_v19  ;;  %v122_v24 = vmul.f32 %v100_v20, %v100_v20  ;;  %v123_v26 = vmul.f32 %v101_v21, %v101_v21 }
  0x19   :  { %v124_v28 = vmul.f32 %v102_v25, %v102_v25  ;;  %p209_p9 = pnand %p208_p8, %p202_p5 }
  0x1a   :  { %v105_v27 = vadd.f32 %v104_v22, %v101_v21  ;;  %v125_v29 = vadd.f32 %v122_v24, %v121_v23 }
  0x1c   :  { %v106_v30 = vadd.f32 %v105_v27, %v102_v25  ;;  %v126_v31 = vadd.f32 %v125_v29, %v123_v26 }
  0x1e   :  { %107 = vadd.xlane.f32.xlu0 %v106_v30  ;;  %v127_v32 = vadd.f32 %v126_v31, %v124_v28 }
  0x22   :  { %128 = vadd.xlane.f32.xlu0 %v127_v32 }
  0xa7   :  { %v108_v34 = vpop.xlane.xlu0 %107 }
  0xa8   :  { %v109_v35 = vrot.slane %v108_v34, 4 }
  0xaa   :  { %v110_v36 = vadd.f32 %v109_v35, %v108_v34 }
  0xab   :  { %v129_v37 = vpop.xlane.xlu0 %128 }
  0xac   :  { %v111_v38 = vrot.slane %v110_v36, 2  ;;  %v130_v39 = vrot.slane %v129_v37, 4 }
  0xae   :  { %v131_v40 = vadd.f32 %v130_v39, %v129_v37  ;;  %v112_v41 = vadd.f32 %v111_v38, %v110_v36 }
  0xb0   :  { %v132_v42 = vrot.slane %v131_v40, 2  ;;  %v113_v43 = vrot.slane %v112_v41, 1 }
  0xb2   :  { %v133_v44 = vadd.f32 %v132_v42, %v131_v40  ;;  %v114_v45 = vadd.f32 %v113_v43, %v112_v41 }
  0xb4   :  { %173 = vpush %v114_v45  ;;  %v134_v46 = vrot.slane %v133_v44, 1 }
  0xb6   :  { %v135_v47 = vadd.f32 %v134_v46, %v133_v44 }
  0xb8   :  { %175 = vpush %v135_v47 }
  0xe5   :  { %s174_s15 = spop %173 }
  0xe6   :  { %v116_v49 = vstv %s174_s15 }
  0xe7   :  { %v117_v50 = vadd.f32 %v116_v49, %v103_v48 }
  0xe9   :  { %119 = vst.msk [vmem:[#allocation5] sm:$0x1] %vm28_vm4, %v117_v50  ;;  %s176_s18 = spop %175 }
  0xea   :  { %v137_v52 = vstv %s176_s18 }
  0xeb   :  { %212 = shalt.err (!%p209_p9)
}
  0xec   :  { %149 = dma.vmem_to_hbm [thread:$0]  %s147_s14, 16, %s280_s1, [#allocation4]   ;;  %v138_v53 = vadd.f32 %v137_v52, %v120_v51 }
  0xed   :  { %s221_s23 = scalar_lea.vmem %s157_s17, 16  ;;  %s225_s24 = scalar_lea.vmem %s157_s17, 32 }
  0xee   :  { %139 = vst.msk [vmem:[#allocation6] sm:$0x1] %vm28_vm4, %v138_v53  ;;  %p222_p10 = scmp.ne.s32.totalorder %s157_s17, %s221_s23  ;;  %p226_p11 = scmp.lt.s32.totalorder %s157_s17, %s157_s17 }
  0xef   :  { %p227_p12 = scmp.lt.s32.totalorder %s225_s24, %s221_s23 }
  0xf1   :  { %p228_p13 = por %p227_p12, %p226_p11 }
  0xf3   :  { %p229_p0 = pnand %p228_p13, %p222_p10 }
  0xf5   :  { %232 = shalt.err (!%p229_p0)
}
  0xf6   :  { %159 = dma.vmem_to_hbm [thread:$0]  %s157_s17, 16, %s281_s2, [#allocation7]  }
  0xf7   :  { %243 = dma.done.wait [#allocation4], 16  }
  0xf8   :  { %244 = vsyncadd [#allocation4], 4294967280 }
  0xf9   :  { %245 = dma.done.wait [#allocation7], 16  }
  0xfa   :  { %246 = vsyncadd [#allocation7], 4294967280 }
  0xfb   :  { %166 = vsyncpa [#allocation3], 1 }
  0xfc   :  { %167 = vsyncpa [#allocation4], 1 }
  0xfd   :  { %168 = vsyncpa [#allocation7], 1 }

</bundles_post_ra>
